<compile_context>
chip_gen: v5e
topology: v5e:2x2
jax: 0.10.0
libtpu: 0.0.40
codegen_flags: <defaults>
</compile_context>

<pallas_src>
import functools

import jax
import jax.numpy as jnp
import numpy as np
from jax.experimental import pallas as pl
from jax.experimental.pallas import tpu as pltpu


# ----------------------------- Pallas kernel -------------------------------


def _margin_kernel(idx0_ref, idx1_ref, sgn_ref, emb_ref, out_ref,
                   *, margin, beta, eps):
    e = emb_ref[...]                      # (N, D)  f32  embedding table (resident)
    i0 = idx0_ref[...]                    # (1, T)  i32  first index of each pair
    i1 = idx1_ref[...]                    # (1, T)  i32  second index of each pair
    s = sgn_ref[...]                      # (1, T)  f32  +1 pos / -1 neg / 0 pad

    n, d_dim = e.shape
    t = i0.shape[1]

    # One-hot selector with embedding-row on sublanes, pair on lanes.
    row = jax.lax.broadcasted_iota(jnp.int32, (n, t), 0)            # (N, T)
    sel = (row == i0).astype(jnp.float32) - (row == i1).astype(jnp.float32)

    # Gather + subtract in one MXU matmul: diff[d, p] = E[i0[p], d] - E[i1[p], d]
    diff = jax.lax.dot_general(                                     # (D, T)
        e, sel,
        dimension_numbers=(((0,), (0,)), ((), ())),
        preferred_element_type=jnp.float32,
    ) + jnp.float32(eps)                  # torch.pairwise_distance adds eps to the diff

    # Squared distance via a second MXU matmul (sum over D), result stays lane-dense.
    sq = diff * diff                                                # (D, T)
    ones_d = jnp.ones((1, d_dim), jnp.float32)
    d2 = jax.lax.dot_general(                                       # (1, T)
        ones_d, sq,
        dimension_numbers=(((1,), (0,)), ((), ())),
        preferred_element_type=jnp.float32,
    )
    dist = jnp.sqrt(d2)                                             # (1, T)

    # pos: clamp(d - beta + margin, 0);  neg: clamp(beta - d + margin, 0)
    #   => clamp(sign * (d - beta) + margin, 0)
    hinge = jnp.maximum(s * (dist - jnp.float32(beta)) + jnp.float32(margin),
                        jnp.float32(0.0))                           # (1, T)

    # Padded pairs (sign == 0) would contribute `margin`; mask them out.
    out_ref[...] = hinge * jnp.abs(s)


def margin_loss_pallas(embeddings, positive_pairs, negative_pairs,
                       *, margin=1.0, beta=1.2, eps=1e-6, tile=128):
    """embeddings: (N, D) f32; *_pairs: (P, 2)/(Q, 2) int.  Returns (loss, count)."""
    N, D = embeddings.shape
    P = int(positive_pairs.shape[0])
    Q = int(negative_pairs.shape[0])
    M = P + Q

    pairs = jnp.concatenate([positive_pairs, negative_pairs], axis=0)
    pairs = pairs.astype(jnp.int32)
    signs = jnp.concatenate([jnp.ones((P,), jnp.float32),
                             -jnp.ones((Q,), jnp.float32)], axis=0)

    num_tiles = max(1, pl.cdiv(M, tile))
    m_pad = num_tiles * tile
    pad = m_pad - M

    # Lane-major layout: (1, M_pad) so every kernel tensor is a (1, 128) slab.
    idx0 = jnp.pad(pairs[:, 0], (0, pad)).reshape(1, m_pad)          # (1, M_pad) i32
    idx1 = jnp.pad(pairs[:, 1], (0, pad)).reshape(1, m_pad)          # (1, M_pad) i32
    sgn = jnp.pad(signs, (0, pad)).reshape(1, m_pad)                 # (1, M_pad) f32

    kernel = functools.partial(_margin_kernel, margin=margin, beta=beta, eps=eps)

    per_pair = pl.pallas_call(
        kernel,
        out_shape=jax.ShapeDtypeStruct((1, m_pad), jnp.float32),
        grid_spec=pltpu.PrefetchScalarGridSpec(
            num_scalar_prefetch=0,
            grid=(num_tiles,),
            in_specs=[
                pl.BlockSpec((1, tile), lambda i: (0, i)),           # idx0
                pl.BlockSpec((1, tile), lambda i: (0, i)),           # idx1
                pl.BlockSpec((1, tile), lambda i: (0, i)),           # sign
                pl.BlockSpec((N, D), lambda i: (0, 0)),              # embeddings (resident)
            ],
            out_specs=pl.BlockSpec((1, tile), lambda i: (0, i)),
        ),
        compiler_params=pltpu.CompilerParams(
            dimension_semantics=("parallel",)),
    )(idx0, idx1, sgn, embeddings)

    return jnp.sum(per_pair), M


# ------------------------- host-side glue / reference ----------------------


def get_all_pairs(target):
    """Deterministic PairSelector: all (i, j), i < j.
    Same label -> positive pair, different label -> negative pair."""
    # TODO(synk): the original pair_selector is arbitrary user code; this is a
    # simple deterministic stand-in (index bookkeeping stays on host).
    target = np.asarray(target)
    n = len(target)
    pos, neg = [], []
    for i in range(n):
        for j in range(i + 1, n):
            (pos if target[i] == target[j] else neg).append((i, j))
    return (np.asarray(pos, dtype=np.int32).reshape(-1, 2),
            np.asarray(neg, dtype=np.int32).reshape(-1, 2))


def margin_loss_ref(embeddings, positive_pairs, negative_pairs,
                    *, margin=1.0, beta=1.2, eps=1e-6):
    """Pure-JAX transcription of the PyTorch forward."""
    def pdist(a, b):
        return jnp.sqrt(jnp.sum((a - b + eps) ** 2, axis=-1))
    d_ap = pdist(embeddings[positive_pairs[:, 0]], embeddings[positive_pairs[:, 1]])
    d_an = pdist(embeddings[negative_pairs[:, 0]], embeddings[negative_pairs[:, 1]])
    pos_loss = jnp.maximum(d_ap - beta + margin, 0.0)
    neg_loss = jnp.maximum(beta - d_an + margin, 0.0)
    loss = jnp.concatenate([pos_loss, neg_loss], axis=0).sum()
    return loss, positive_pairs.shape[0] + negative_pairs.shape[0]


if __name__ == "__main__":
    key = jax.random.PRNGKey(0)

    N, D = 8, 32                          # batch of 8 embeddings, hidden dim 32
    margin, beta = 1.0, 1.2

    embeddings = jax.random.normal(key, (N, D), dtype=jnp.float32)
    target = np.array([0, 0, 0, 0, 1, 1, 1, 1], dtype=np.int32)

    pos_np, neg_np = get_all_pairs(target)          # (12, 2), (16, 2)
    positive_pairs = jnp.asarray(pos_np, dtype=jnp.int32)
    negative_pairs = jnp.asarray(neg_np, dtype=jnp.int32)

    loss, count = margin_loss_pallas(embeddings, positive_pairs, negative_pairs,
                                     margin=margin, beta=beta)
    loss = jax.block_until_ready(loss)

    ref_loss, ref_count = margin_loss_ref(embeddings, positive_pairs, negative_pairs,
                                          margin=margin, beta=beta)
    np.testing.assert_allclose(np.asarray(loss), np.asarray(ref_loss),
                               rtol=1e-4, atol=1e-4)
    assert count == ref_count

    print("KERNEL_OK")
</pallas_src>

<mosaic_0001>
module attributes {stable_mosaic.version = 11 : i64} {
  func.func @_margin_kernel(%arg0: i32, %arg1: memref<1x128xi32, #tpu.memory_space<vmem>>, %arg2: memref<1x128xi32, #tpu.memory_space<vmem>>, %arg3: memref<1x128xf32, #tpu.memory_space<vmem>>, %arg4: memref<8x32xf32, #tpu.memory_space<vmem>>, %arg5: memref<1x128xf32, #tpu.memory_space<vmem>>) attributes {dimension_semantics = [#tpu.dimension_semantics<parallel>], iteration_bounds = array<i64: 1>, scalar_prefetch = 0 : i64, scratch_operands = 0 : i64, tpu.core_type = #tpu.core_type<tc>, window_params = [{transform_indices = @transform_0, window_bounds = array<i64: 1, 128>}, {transform_indices = @transform_1, window_bounds = array<i64: 1, 128>}, {transform_indices = @transform_2, window_bounds = array<i64: 1, 128>}, {pipeline_mode = #tpu.pipeline_mode<synchronous>, transform_indices = @transform_3, window_bounds = array<i64: 8, 32>}, {transform_indices = @transform_4, window_bounds = array<i64: 1, 128>}]} {
    %c0 = arith.constant 0 : index
    %c0_0 = arith.constant 0 : index
    %0 = vector.load %arg4[%c0, %c0_0] : memref<8x32xf32, #tpu.memory_space<vmem>>, vector<8x32xf32>
    %c0_1 = arith.constant 0 : index
    %c0_2 = arith.constant 0 : index
    %1 = vector.load %arg1[%c0_1, %c0_2] : memref<1x128xi32, #tpu.memory_space<vmem>>, vector<1x128xi32>
    %c0_3 = arith.constant 0 : index
    %c0_4 = arith.constant 0 : index
    %2 = vector.load %arg2[%c0_3, %c0_4] : memref<1x128xi32, #tpu.memory_space<vmem>>, vector<1x128xi32>
    %c0_5 = arith.constant 0 : index
    %c0_6 = arith.constant 0 : index
    %3 = vector.load %arg3[%c0_5, %c0_6] : memref<1x128xf32, #tpu.memory_space<vmem>>, vector<1x128xf32>
    %4 = tpu.iota {dimensions = array<i32: 0>} : vector<8x128xi32>
    %5 = vector.broadcast %1 : vector<1x128xi32> to vector<8x128xi32>
    %6 = arith.cmpi eq, %4, %5 : vector<8x128xi32>
    %7 = arith.extui %6 : vector<8x128xi1> to vector<8x128xi32>
    %8 = arith.sitofp %7 : vector<8x128xi32> to vector<8x128xf32>
    %9 = vector.broadcast %2 : vector<1x128xi32> to vector<8x128xi32>
    %10 = arith.cmpi eq, %4, %9 : vector<8x128xi32>
    %11 = arith.extui %10 : vector<8x128xi1> to vector<8x128xi32>
    %12 = arith.sitofp %11 : vector<8x128xi32> to vector<8x128xf32>
    %13 = arith.subf %8, %12 : vector<8x128xf32>
    %cst = arith.constant dense<0.000000e+00> : vector<32x128xf32>
    %14 = tpu.matmul %0, %13, %cst {dimension_numbers = #tpu.dot_dimension_numbers<[0], [0], [1], [1], [0, 1, 1, 1], [], []>} : vector<8x32xf32>, vector<8x128xf32>, vector<32x128xf32> -> vector<32x128xf32>
    %cst_7 = arith.constant 9.99999997E-7 : f32
    %15 = vector.broadcast %cst_7 : f32 to vector<32x128xf32>
    %16 = arith.addf %14, %15 : vector<32x128xf32>
    %17 = arith.mulf %16, %16 : vector<32x128xf32>
    %cst_8 = arith.constant 1.000000e+00 : f32
    %18 = vector.broadcast %cst_8 : f32 to vector<1x32xf32>
    %cst_9 = arith.constant dense<0.000000e+00> : vector<1x128xf32>
    %19 = tpu.matmul %18, %17, %cst_9 {dimension_numbers = #tpu.dot_dimension_numbers<[1], [0], [0], [1], [0, 0, 1, 1], [], []>} : vector<1x32xf32>, vector<32x128xf32>, vector<1x128xf32> -> vector<1x128xf32>
    %20 = math.sqrt %19 : vector<1x128xf32>
    %cst_10 = arith.constant 1.200000e+00 : f32
    %21 = vector.broadcast %cst_10 : f32 to vector<1x128xf32>
    %22 = arith.subf %20, %21 : vector<1x128xf32>
    %23 = arith.mulf %3, %22 : vector<1x128xf32>
    %cst_11 = arith.constant 1.000000e+00 : f32
    %24 = vector.broadcast %cst_11 : f32 to vector<1x128xf32>
    %25 = arith.addf %23, %24 : vector<1x128xf32>
    %cst_12 = arith.constant 0.000000e+00 : f32
    %26 = vector.broadcast %cst_12 : f32 to vector<1x128xf32>
    %27 = arith.maximumf %25, %26 : vector<1x128xf32>
    %28 = math.absf %3 : vector<1x128xf32>
    %29 = arith.mulf %27, %28 : vector<1x128xf32>
    %c0_13 = arith.constant 0 : index
    %c0_14 = arith.constant 0 : index
    %30 = vector.load %arg5[%c0_13, %c0_14] : memref<1x128xf32, #tpu.memory_space<vmem>>, vector<1x128xf32>
    tpu.vector_store %arg5[%c0_13, %c0_14], %29 {strides = array<i32>} : memref<1x128xf32, #tpu.memory_space<vmem>>, vector<1x128xf32>,
    return
  }
  func.func @transform_0(%arg0: i32) -> (i32, i32) {
    %c0_i32 = arith.constant 0 : i32
    %c0_i32_0 = arith.constant 0 : i32
    return %c0_i32, %arg0 : i32, i32
  }
  func.func @transform_1(%arg0: i32) -> (i32, i32) {
    %c0_i32 = arith.constant 0 : i32
    %c0_i32_0 = arith.constant 0 : i32
    return %c0_i32, %arg0 : i32, i32
  }
  func.func @transform_2(%arg0: i32) -> (i32, i32) {
    %c0_i32 = arith.constant 0 : i32
    %c0_i32_0 = arith.constant 0 : i32
    return %c0_i32, %arg0 : i32, i32
  }
  func.func @transform_3(%arg0: i32) -> (i32, i32) {
    %c0_i32 = arith.constant 0 : i32
    %c0_i32_0 = arith.constant 0 : i32
    %c0_i32_1 = arith.constant 0 : i32
    return %c0_i32, %c0_i32_0 : i32, i32
  }
  func.func @transform_4(%arg0: i32) -> (i32, i32) {
    %c0_i32 = arith.constant 0 : i32
    %c0_i32_0 = arith.constant 0 : i32
    return %c0_i32, %arg0 : i32, i32
  }
}

</mosaic_0001>

<bundles_post_ra>
// kernel: tpu_custom_call.1
= control target key start
LH: loop header
LB: loop body
LE: loop exit
PB: predicated region body
PF: predicated region fallthrough
CT: control target
= control target key end

     0   :  { %9 = vsyncpa [#allocation3], 0  ;;  %s381_s0 = inlined_call_operand.hbm [shape: s32[1,128], index: 0, kind: input, shape index: {}]   ;;  %s382_s1 = inlined_call_operand.hbm [shape: s32[1,128], index: 1, kind: input, shape index: {}]   ;;  %s383_s2 = inlined_call_operand.vmem [shape: f32[1,128], index: 2, kind: input, shape index: {}]   ;;  %s384_s3 = inlined_call_operand.hbm [shape: f32[8,32], index: 3, kind: input, shape index: {}]   ;;  %s385_s4 = inlined_call_operand.hbm [shape: f32[1,128], index: 4, kind: output, shape index: {}]  }
   0x1   :  { %10 = vsyncpa [#allocation6], 0  ;;  %s28_s17 = sshll.u32 %s382_s1, 4  ;;  %s29_s17 = int_to_ptr.hbm [resolvable:$true] %s28_s17 }
   0x2   :  { %11 = vsyncpa [#allocation4], 0  ;;  %s335_s18 = smov [#allocation5]   ;;  %s17_s22 = sshll.u32 %s381_s0, 4  ;;  %s18_s22 = int_to_ptr.hbm [resolvable:$true] %s17_s22 }
   0x3   :  { %s30_s19 = sshll.u32 %s335_s18, 4  ;;  %s336_s23 = smov [#allocation2]   ;;  %s31_s19 = int_to_ptr.vmem [resolvable:$true] %s30_s19 }
   0x4   :  { %33 = dma.hbm_to_vmem [thread:$0]  %s29_s17, 16, %s31_s19, [#allocation6]  }
   0x5   :  { %s19_s24 = sshll.u32 %s336_s23, 4  ;;  %s41_s27 = sshll.u32 %s384_s3, 4  ;;  %s20_s24 = int_to_ptr.vmem [resolvable:$true] %s19_s24  ;;  %s42_s27 = int_to_ptr.hbm [resolvable:$true] %s41_s27 }
   0x6   :  { %22 = dma.hbm_to_vmem [thread:$0]  %s18_s22, 16, %s20_s24, [#allocation3]  }
   0x7   :  { %s337_s1 = smov [#allocation7]  }
   0x8   :  { %s43_s28 = sshll.u32 %s337_s1, 4  ;;  %s44_s28 = int_to_ptr.vmem [resolvable:$true] %s43_s28 }
   0x9   :  { %46 = dma.hbm_to_vmem [thread:$0]  %s42_s27, 128, %s44_s28, [#allocation6]  }
   0xa   :  { %329 = dma.done.wait [#allocation3], 16  }
   0xb   :  { %330 = vsyncadd [#allocation3], 4294967280 }
   0xc   :  { %331 = dma.done.wait [#allocation6], 144  }
   0xd   :  { %332 = vsyncadd [#allocation6], 4294967152  ;;  %v63_v0 = vlaneseq  ;;  %v59_v2 = vld [vmem:[#allocation7] sm:$0xff]  ;;  %v229_v3 = vld [vmem:[#allocation2] ss:$0 sm:$0xff]  ;;  %v338_v5 = vmov 0.0  }
   0xe   :  { %74 = vxpose.xlu0.b32.start.end [1/1] (short) (narrow) %v59_v2, 32  ;;  %v230_v4 = vld [vmem:[#allocation5] ss:$0 sm:$0xff]  ;;  %vm106_vm2 = vcmask 64512   ;;  %vm152_vm3 = vcmask 261120   ;;  %v339_v25 = vmov 1.0  }
   0xf   :  { %v64_v1 = vshrl.u32 %v63_v0, 7  ;;  %v62_v36 = vld [vmem:[%s383_s2] sm:$0x1]  ;;  %s340_s29 = smov [#allocation8]   ;;  %s202_s7 = sshll.u32 %s385_s4, 4  ;;  %s203_s7 = int_to_ptr.hbm [resolvable:$true] %s202_s7 }
  0x10   :  { %v192_v41 = vand.u32 2147483647, %v62_v36  ;;  %s200_s30 = sshll.u32 %s340_s29, 4  ;;  %s201_s30 = int_to_ptr.vmem [resolvable:$true] %s200_s30 }
  0x11   :  { %vm66_vm0 = vcmp.eq.s32.totalorder %v64_v1, %v229_v3  ;;  %vm70_vm1 = vcmp.eq.s32.totalorder %v64_v1, %v230_v4 }
  0x12   :  { %v213_v6 = vsel %vm66_vm0, 1.0, %v338_v5  ;;  %v214_v7 = vsel %vm70_vm1, 1.0, %v338_v5 }
  0x13   :  { %v73_v8 = vsub.f32 %v213_v6, %v214_v7 }
  0x15   :  { %134 = vmatpush.msra.mxu0 %v73_v8  ;;  %221 = vmatpush.msra.mxu2 %v73_v8 }
  0x16   :  { %222 = vmatpush.msra.mxu3 %v73_v8 }
  0xb2   :  { %v90_v9 = vpop.trf.xlu0 }
  0xb3   :  { %215 = vmatmul.msk.f32.vlgmr.msra.gmra.mxu0 %vm106_vm2, %v90_v9 }
  0xba   :  { %v91_v10 = vpop.trf.xlu0 }
  0xbb   :  { %216 = vmatmul.msk.f32.vlgmr.msra.gmra.mxu2 %vm106_vm2, %v91_v10 }
  0xc2   :  { %v92_v11 = vpop.trf.xlu0 }
  0xc3   :  { %217 = vmatmul.msk.f32.gmra.mxu2 %vm106_vm2, %v92_v11 }
  0xca   :  { %v93_v12 = vpop.trf.xlu0 }
  0xcb   :  { %218 = vmatmul.msk.f32.vlgmr.msra.gmra.mxu3 %vm106_vm2, %v93_v12 }
 0x130   :  { %v136_v18 = vpop.f32.mrf.mxu0 }
 0x131   :  { %v137_v21 = vadd.f32 1e-06, %v136_v18 }
 0x133   :  { %v148_v24 = vmul.f32 %v137_v21, %v137_v21 }
 0x13e   :  { %v139_v13 = vpop.f32.mrf.mxu2 }
 0x13f   :  { %v140_v19 = vadd.f32 1e-06, %v139_v13 }
 0x141   :  { %v149_v23 = vmul.f32 %v140_v19, %v140_v19 }
 0x146   :  { %v142_v14 = vpop.f32.mrf.mxu2 }
 0x147   :  { %v143_v16 = vadd.f32 1e-06, %v142_v14 }
 0x149   :  { %v150_v22 = vmul.f32 %v143_v16, %v143_v16 }
 0x14e   :  { %v145_v15 = vpop.f32.mrf.mxu3 }
 0x14f   :  { %v146_v17 = vadd.f32 1e-06, %v145_v15 }
 0x151   :  { %v151_v20 = vmul.f32 %v146_v17, %v146_v17 }
 0x153   :  { %168 = vmatpush.msra.mxu1 %v151_v20 }
 0x155   :  { %169 = vmatpush.msra.mxu1 %v150_v22 }
 0x157   :  { %170 = vmatpush.msra.mxu1 %v149_v23 }
 0x159   :  { %171 = vmatpush.msra.mxu1 %v148_v24 }
 0x15a   :  { %219 = vmatmul.msk.f32.vlgmr.msra.gmra.mxu1 %vm152_vm3, %v339_v25 }
 0x1d7   :  { %v173_v26 = vpop.f32.mrf.mxu1 }
 0x1d8   :  { %231 = vrsqrt.f32 %v173_v26  ;;  %vm183_vm4 = vcmp.eq.f32.partialorder %v173_v26, inf  ;;  %v186_v34 = vand.u32 2147483648, %v173_v26  ;;  %vm185_vm5 = vcmp.eq.f32.partialorder %v173_v26, 0.0 }
 0x1de   :  { %v232_v27 = vpop.eup %231 }
 0x1df   :  { %v177_v28 = vmul.f32 %v232_v27, %v173_v26 }
 0x1e1   :  { %v178_v29 = vmul.f32 %v232_v27, %v177_v28 }
 0x1e3   :  { %v179_v30 = vmul.f32 0.5, %v178_v29 }
 0x1e5   :  { %v180_v31 = vsub.f32 1.5, %v179_v30 }
 0x1e7   :  { %v181_v32 = vmul.f32 %v232_v27, %v180_v31 }
 0x1e9   :  { %v182_v33 = vmul.f32 %v181_v32, %v173_v26 }
 0x1eb   :  { %v184_v35 = vsel %vm183_vm4, %v173_v26, %v182_v33 }
 0x1ec   :  { %v187_v37 = vsel %vm185_vm5, %v186_v34, %v184_v35 }
 0x1ed   :  { %v220_v38 = vadd.f32 -1.2, %v187_v37 }
 0x1ef   :  { %v189_v39 = vmul.f32 %v220_v38, %v62_v36 }
 0x1f1   :  { %v190_v40 = vadd.f32 1.0, %v189_v39 }
 0x1f3   :  { %v191_v42 = vmax.f32 %v190_v40, 0.0 }
 0x1f5   :  { %v193_v43 = vmul.f32 %v192_v41, %v191_v42 }
 0x1f7   :  { %194 = vst [vmem:[#allocation8] sm:$0x1] %v193_v43 }
 0x1f8   :  { %205 = dma.vmem_to_hbm [thread:$0]  %s201_s30, 16, %s203_s7, [#allocation4]  }
 0x1f9   :  { %333 = dma.done.wait [#allocation4], 16  }
 0x1fa   :  { %334 = vsyncadd [#allocation4], 4294967280 }
 0x1fb   :  { %210 = vsyncpa [#allocation3], 1 }
 0x1fc   :  { %211 = vsyncpa [#allocation6], 1 }
 0x1fd   :  { %212 = vsyncpa [#allocation4], 1 }

</bundles_post_ra>
